<compile_context>
chip_gen: v7x
topology: tpu7x:2x2x1
jax: 0.10.0
libtpu: 0.0.40
codegen_flags: <defaults>
</compile_context>

<pallas_src>
import functools

import jax
import jax.numpy as jnp
from jax.experimental import pallas as pl
from jax.experimental.pallas import tpu as pltpu

_EPS = 1e-6  # matches nn.CosineSimilarity(eps=1e-6)


def _triplet_kernel(embs_ref, *rest, method, margin):
    """embs_ref: (TB, 3, D). Outputs hinge / ap_sim / an_sim, each (TB, 1)."""
    if margin is None:
        ansim_ref, hinge_ref, ap_sim_ref, an_sim_ref = rest
    else:
        ansim_ref = None
        hinge_ref, ap_sim_ref, an_sim_ref = rest

    a = embs_ref[:, 0, :].astype(jnp.float32)   # (TB, D)
    p = embs_ref[:, 1, :].astype(jnp.float32)
    n = embs_ref[:, 2, :].astype(jnp.float32)

    if method == "cosine":
        # Hoisted anchor norm, reused for both (a,p) and (a,n) pairs.
        na2 = jnp.sum(a * a, axis=-1, keepdims=True)            # (TB, 1)
        np2 = jnp.sum(p * p, axis=-1, keepdims=True)
        nn2 = jnp.sum(n * n, axis=-1, keepdims=True)
        ap_dot = jnp.sum(a * p, axis=-1, keepdims=True)
        an_dot = jnp.sum(a * n, axis=-1, keepdims=True)
        eps2 = jnp.float32(_EPS * _EPS)
        # rsqrt(max(||a||^2*||b||^2, eps^2)) == 1 / max(||a||*||b||, eps);
        # rsqrt runs on the otherwise-idle EUP slot (no VPU divide/sqrt).
        cos_ap = ap_dot * jax.lax.rsqrt(jnp.maximum(na2 * np2, eps2))
        cos_an = an_dot * jax.lax.rsqrt(jnp.maximum(na2 * nn2, eps2))
        ap_dist = (1.0 - cos_ap) * 0.5
        an_dist = (1.0 - cos_an) * 0.5
    elif method == "rbf":
        gamma = 1.0
        dp = a - p
        dn = a - n
        ap_dist = 1.0 - jnp.exp(-gamma * jnp.sum(dp * dp, axis=-1, keepdims=True))
        an_dist = 1.0 - jnp.exp(-gamma * jnp.sum(dn * dn, axis=-1, keepdims=True))
    else:
        raise ValueError(f"unknown triplet_method: {method}")

    if margin is None:
        m = 1.0 - ansim_ref[...].astype(jnp.float32)             # (TB, 1)
    else:
        m = jnp.float32(margin)

    # Per-row results.  Rows past B in a partial final tile are masked out by
    # Pallas on write-back, so they never reach the glue-side reduction.
    hinge_ref[...] = jnp.maximum(ap_dist - an_dist + m, 0.0)
    ap_sim_ref[...] = 1.0 - ap_dist
    an_sim_ref[...] = 1.0 - an_dist


def _pick_block_rows(B, D, itemsize):
    # Input block (TB, 3, D): the minor (3, D) dims are sublane-padded to
    # (8, D) in VMEM and double-buffered by the pipeline -> ~2*8*D*itemsize
    # bytes per row.  Target ~12 MiB so the pipeline working set fits v7x's
    # 64 MiB VMEM with headroom for the in-kernel f32 temporaries.
    budget = 12 * 1024 * 1024
    per_row = 2 * 8 * D * itemsize
    tb = int(max(8, min(512, (budget // per_row) // 8 * 8)))
    return B if B <= tb else tb


def triplet_loss(output_embs, an_similarity=None, *,
                 triplet_method="cosine", triplet_margin=None,
                 reduction="mean", block_rows=None):
    """Pallas TPU implementation of Triplet_Loss.forward.

    output_embs:   (B, 3, D)  (f32 or bf16; anchors / positives / negatives)
    an_similarity: (B,)       only used when triplet_margin is None
    returns: (loss, embs_ap_similarity (B,), embs_an_similarity (B,))
    """
    B, three, D = output_embs.shape
    assert three == 3

    itemsize = jnp.dtype(output_embs.dtype).itemsize
    tb = block_rows if block_rows is not None else _pick_block_rows(B, D, itemsize)
    tb = min(int(tb), B)
    grid = (pl.cdiv(B, tb),)

    in_specs = [pl.BlockSpec((tb, 3, D), lambda i: (i, 0, 0))]
    args = [output_embs]
    if triplet_margin is None:
        if an_similarity is None:
            raise ValueError("an_similarity is required when triplet_margin is None")
        in_specs.append(pl.BlockSpec((tb, 1), lambda i: (i, 0)))
        args.append(an_similarity.reshape(B, 1).astype(jnp.float32))
    # else: fixed margin -> an_similarity is not passed / DMA'd at all.

    col_spec = pl.BlockSpec((tb, 1), lambda i: (i, 0))
    kernel = functools.partial(_triplet_kernel, method=triplet_method,
                               margin=triplet_margin)

    hinge, ap_sim, an_sim = pl.pallas_call(
        kernel,
        grid=grid,
        out_shape=(
            jax.ShapeDtypeStruct((B, 1), jnp.float32),
            jax.ShapeDtypeStruct((B, 1), jnp.float32),
            jax.ShapeDtypeStruct((B, 1), jnp.float32),
        ),
        in_specs=in_specs,
        out_specs=(col_spec, col_spec, col_spec),
        compiler_params=pltpu.CompilerParams(
            dimension_semantics=("parallel",)),
    )(*args)

    hinge = hinge[:, 0]
    if reduction == "mean":
        loss = jnp.mean(hinge)      # tiny (B,) reduction in glue; true-B divisor
    elif reduction == "sum":
        loss = jnp.sum(hinge)
    else:
        loss = hinge                # mirrors the module's fall-through behavior
    return loss, ap_sim[:, 0], an_sim[:, 0]


def _reference(output_embs, an_similarity, *, triplet_method, triplet_margin,
               reduction):
    a = output_embs[:, 0].astype(jnp.float32)
    p = output_embs[:, 1].astype(jnp.float32)
    n = output_embs[:, 2].astype(jnp.float32)
    if triplet_method == "cosine":
        def dist(x, y):
            dot = jnp.sum(x * y, axis=-1)
            nx = jnp.sqrt(jnp.sum(x * x, axis=-1))
            ny = jnp.sqrt(jnp.sum(y * y, axis=-1))
            return (1.0 - dot / jnp.maximum(nx * ny, _EPS)) / 2.0
    else:
        def dist(x, y):
            return 1.0 - jnp.exp(-jnp.sum((x - y) ** 2, axis=-1))
    ap, an = dist(a, p), dist(a, n)
    m = (1.0 - an_similarity) if triplet_margin is None else triplet_margin
    hinge = jnp.maximum(ap - an + m, 0.0)
    if reduction == "mean":
        loss = jnp.mean(hinge)
    elif reduction == "sum":
        loss = jnp.sum(hinge)
    else:
        loss = hinge
    return loss, 1.0 - ap, 1.0 - an


if __name__ == "__main__":
    key = jax.random.PRNGKey(0)
    k1, k2, k3, k4 = jax.random.split(key, 4)

    # Small demo shapes.
    B, D = 8, 128
    output_embs = jax.random.normal(k1, (B, 3, D), dtype=jnp.float32)
    an_similarity = jax.random.uniform(k2, (B,), dtype=jnp.float32)

    # cfg: cosine, per-sample margin from an_similarity, mean reduction.
    cfg = dict(triplet_method="cosine", triplet_margin=None, reduction="mean")
    loss, ap_sim, an_sim = triplet_loss(output_embs, an_similarity, **cfg)
    jax.block_until_ready((loss, ap_sim, an_sim))

    ref_loss, ref_ap, ref_an = _reference(output_embs, an_similarity, **cfg)
    assert jnp.allclose(loss, ref_loss, atol=1e-5)
    assert jnp.allclose(ap_sim, ref_ap, atol=1e-5)
    assert jnp.allclose(an_sim, ref_an, atol=1e-5)

    # rbf path with a fixed margin and sum reduction (an_similarity not DMA'd).
    cfg2 = dict(triplet_method="rbf", triplet_margin=0.3, reduction="sum")
    loss2, ap2, an2 = triplet_loss(output_embs, an_similarity, **cfg2)
    jax.block_until_ready((loss2, ap2, an2))
    ref2 = _reference(output_embs, an_similarity, **cfg2)
    assert jnp.allclose(loss2, ref2[0], atol=1e-5)
    assert jnp.allclose(ap2, ref2[1], atol=1e-5)
    assert jnp.allclose(an2, ref2[2], atol=1e-5)

    # Multi-block grid with a partial final tile (B not a multiple of TB).
    B2, D2 = 20, 256
    oe2 = jax.random.normal(k3, (B2, 3, D2), dtype=jnp.float32)
    ansim2 = jax.random.uniform(k4, (B2,), dtype=jnp.float32)
    loss3, ap3, an3 = triplet_loss(oe2, ansim2, block_rows=8, **cfg)
    jax.block_until_ready((loss3, ap3, an3))
    ref3 = _reference(oe2, ansim2, **cfg)
    assert jnp.allclose(loss3, ref3[0], atol=1e-5)
    assert jnp.allclose(ap3, ref3[1], atol=1e-5)
    assert jnp.allclose(an3, ref3[2], atol=1e-5)

    print("KERNEL_OK")
</pallas_src>

<mosaic_0001>
module attributes {stable_mosaic.version = 11 : i64} {
  func.func @_triplet_kernel(%arg0: i32, %arg1: memref<8x3x128xf32, #tpu.memory_space<vmem>>, %arg2: memref<8x1xf32, #tpu.memory_space<vmem>>, %arg3: memref<8x1xf32, #tpu.memory_space<vmem>>, %arg4: memref<8x1xf32, #tpu.memory_space<vmem>>, %arg5: memref<8x1xf32, #tpu.memory_space<vmem>>) attributes {dimension_semantics = [#tpu.dimension_semantics<parallel>], iteration_bounds = array<i64: 1>, scalar_prefetch = 0 : i64, scratch_operands = 0 : i64, tpu.core_type = #tpu.core_type<tc>, window_params = [{transform_indices = @transform_0, window_bounds = array<i64: 8, 3, 128>}, {transform_indices = @transform_1, window_bounds = array<i64: 8, 1>}, {transform_indices = @transform_2, window_bounds = array<i64: 8, 1>}, {transform_indices = @transform_3, window_bounds = array<i64: 8, 1>}, {transform_indices = @transform_4, window_bounds = array<i64: 8, 1>}]} {
    %c0 = arith.constant 0 : index
    %c0_0 = arith.constant 0 : index
    %c0_1 = arith.constant 0 : index
    %0 = vector.load %arg1[%c0, %c0_0, %c0_1] : memref<8x3x128xf32, #tpu.memory_space<vmem>>, vector<8x1x128xf32>
    %1 = vector.shape_cast %0 : vector<8x1x128xf32> to vector<8x128xf32>
    %c0_2 = arith.constant 0 : index
    %c1 = arith.constant 1 : index
    %c0_3 = arith.constant 0 : index
    %2 = vector.load %arg1[%c0_2, %c1, %c0_3] : memref<8x3x128xf32, #tpu.memory_space<vmem>>, vector<8x1x128xf32>
    %3 = vector.shape_cast %2 : vector<8x1x128xf32> to vector<8x128xf32>
    %c0_4 = arith.constant 0 : index
    %c2 = arith.constant 2 : index
    %c0_5 = arith.constant 0 : index
    %4 = vector.load %arg1[%c0_4, %c2, %c0_5] : memref<8x3x128xf32, #tpu.memory_space<vmem>>, vector<8x1x128xf32>
    %5 = vector.shape_cast %4 : vector<8x1x128xf32> to vector<8x128xf32>
    %6 = arith.mulf %1, %1 : vector<8x128xf32>
    %cst = arith.constant dense<0.000000e+00> : vector<8xf32>
    %7 = vector.multi_reduction <add>, %6, %cst [1] : vector<8x128xf32> to vector<8xf32>
    %8 = vector.shape_cast %7 : vector<8xf32> to vector<8x1xf32>
    %9 = arith.mulf %3, %3 : vector<8x128xf32>
    %cst_6 = arith.constant dense<0.000000e+00> : vector<8xf32>
    %10 = vector.multi_reduction <add>, %9, %cst_6 [1] : vector<8x128xf32> to vector<8xf32>
    %11 = vector.shape_cast %10 : vector<8xf32> to vector<8x1xf32>
    %12 = arith.mulf %5, %5 : vector<8x128xf32>
    %cst_7 = arith.constant dense<0.000000e+00> : vector<8xf32>
    %13 = vector.multi_reduction <add>, %12, %cst_7 [1] : vector<8x128xf32> to vector<8xf32>
    %14 = vector.shape_cast %13 : vector<8xf32> to vector<8x1xf32>
    %15 = arith.mulf %1, %3 : vector<8x128xf32>
    %cst_8 = arith.constant dense<0.000000e+00> : vector<8xf32>
    %16 = vector.multi_reduction <add>, %15, %cst_8 [1] : vector<8x128xf32> to vector<8xf32>
    %17 = vector.shape_cast %16 : vector<8xf32> to vector<8x1xf32>
    %18 = arith.mulf %1, %5 : vector<8x128xf32>
    %cst_9 = arith.constant dense<0.000000e+00> : vector<8xf32>
    %19 = vector.multi_reduction <add>, %18, %cst_9 [1] : vector<8x128xf32> to vector<8xf32>
    %20 = vector.shape_cast %19 : vector<8xf32> to vector<8x1xf32>
    %21 = arith.mulf %8, %11 : vector<8x1xf32>
    %cst_10 = arith.constant 9.99999996E-13 : f32
    %22 = vector.broadcast %cst_10 : f32 to vector<8x1xf32>
    %23 = arith.maximumf %21, %22 : vector<8x1xf32>
    %24 = math.rsqrt %23 : vector<8x1xf32>
    %25 = arith.mulf %17, %24 : vector<8x1xf32>
    %26 = arith.mulf %8, %14 : vector<8x1xf32>
    %cst_11 = arith.constant 9.99999996E-13 : f32
    %27 = vector.broadcast %cst_11 : f32 to vector<8x1xf32>
    %28 = arith.maximumf %26, %27 : vector<8x1xf32>
    %29 = math.rsqrt %28 : vector<8x1xf32>
    %30 = arith.mulf %20, %29 : vector<8x1xf32>
    %cst_12 = arith.constant 1.000000e+00 : f32
    %31 = vector.broadcast %cst_12 : f32 to vector<8x1xf32>
    %32 = arith.subf %31, %25 : vector<8x1xf32>
    %cst_13 = arith.constant 5.000000e-01 : f32
    %33 = vector.broadcast %cst_13 : f32 to vector<8x1xf32>
    %34 = arith.mulf %32, %33 : vector<8x1xf32>
    %cst_14 = arith.constant 1.000000e+00 : f32
    %35 = vector.broadcast %cst_14 : f32 to vector<8x1xf32>
    %36 = arith.subf %35, %30 : vector<8x1xf32>
    %cst_15 = arith.constant 5.000000e-01 : f32
    %37 = vector.broadcast %cst_15 : f32 to vector<8x1xf32>
    %38 = arith.mulf %36, %37 : vector<8x1xf32>
    %c0_16 = arith.constant 0 : index
    %c0_17 = arith.constant 0 : index
    %39 = vector.load %arg2[%c0_16, %c0_17] : memref<8x1xf32, #tpu.memory_space<vmem>>, vector<8x1xf32>
    %cst_18 = arith.constant 1.000000e+00 : f32
    %40 = vector.broadcast %cst_18 : f32 to vector<8x1xf32>
    %41 = arith.subf %40, %39 : vector<8x1xf32>
    %42 = arith.subf %34, %38 : vector<8x1xf32>
    %43 = arith.addf %42, %41 : vector<8x1xf32>
    %cst_19 = arith.constant 0.000000e+00 : f32
    %44 = vector.broadcast %cst_19 : f32 to vector<8x1xf32>
    %45 = arith.maximumf %43, %44 : vector<8x1xf32>
    %c0_20 = arith.constant 0 : index
    %c0_21 = arith.constant 0 : index
    %46 = vector.load %arg3[%c0_20, %c0_21] : memref<8x1xf32, #tpu.memory_space<vmem>>, vector<8x1xf32>
    tpu.vector_store %arg3[%c0_20, %c0_21], %45 {strides = array<i32>} : memref<8x1xf32, #tpu.memory_space<vmem>>, vector<8x1xf32>,
    %cst_22 = arith.constant 1.000000e+00 : f32
    %47 = vector.broadcast %cst_22 : f32 to vector<8x1xf32>
    %48 = arith.subf %47, %34 : vector<8x1xf32>
    %c0_23 = arith.constant 0 : index
    %c0_24 = arith.constant 0 : index
    %49 = vector.load %arg4[%c0_23, %c0_24] : memref<8x1xf32, #tpu.memory_space<vmem>>, vector<8x1xf32>
    tpu.vector_store %arg4[%c0_23, %c0_24], %48 {strides = array<i32>} : memref<8x1xf32, #tpu.memory_space<vmem>>, vector<8x1xf32>,
    %cst_25 = arith.constant 1.000000e+00 : f32
    %50 = vector.broadcast %cst_25 : f32 to vector<8x1xf32>
    %51 = arith.subf %50, %38 : vector<8x1xf32>
    %c0_26 = arith.constant 0 : index
    %c0_27 = arith.constant 0 : index
    %52 = vector.load %arg5[%c0_26, %c0_27] : memref<8x1xf32, #tpu.memory_space<vmem>>, vector<8x1xf32>
    tpu.vector_store %arg5[%c0_26, %c0_27], %51 {strides = array<i32>} : memref<8x1xf32, #tpu.memory_space<vmem>>, vector<8x1xf32>,
    return
  }
  func.func @transform_0(%arg0: i32) -> (i32, i32, i32) {
    %c0_i32 = arith.constant 0 : i32
    %c0_i32_0 = arith.constant 0 : i32
    %c0_i32_1 = arith.constant 0 : i32
    return %arg0, %c0_i32, %c0_i32_0 : i32, i32, i32
  }
  func.func @transform_1(%arg0: i32) -> (i32, i32) {
    %c0_i32 = arith.constant 0 : i32
    %c0_i32_0 = arith.constant 0 : i32
    return %arg0, %c0_i32 : i32, i32
  }
  func.func @transform_2(%arg0: i32) -> (i32, i32) {
    %c0_i32 = arith.constant 0 : i32
    %c0_i32_0 = arith.constant 0 : i32
    return %arg0, %c0_i32 : i32, i32
  }
  func.func @transform_3(%arg0: i32) -> (i32, i32) {
    %c0_i32 = arith.constant 0 : i32
    %c0_i32_0 = arith.constant 0 : i32
    return %arg0, %c0_i32 : i32, i32
  }
  func.func @transform_4(%arg0: i32) -> (i32, i32) {
    %c0_i32 = arith.constant 0 : i32
    %c0_i32_0 = arith.constant 0 : i32
    return %arg0, %c0_i32 : i32, i32
  }
}

</mosaic_0001>

<bundles_post_ra>
// kernel: tpu_custom_call.1
= control target key start
LH: loop header
LB: loop body
LE: loop exit
PB: predicated region body
PF: predicated region fallthrough
CT: control target
= control target key end

     0   :  { %vm55_vm0 = vcmask 1041409   ;;  %vm58_vm1 = vcmask 1042434   ;;  %vm61_vm2 = vcmask 1043459   ;;  %vm64_vm3 = vcmask 1044484   ;;  %s506_s0 = inlined_call_operand.vmem [shape: f32[8,3,128], index: 0, kind: input, shape index: {}]   ;;  %s507_s1 = inlined_call_operand.vmem [shape: f32[8,1], index: 1, kind: input, shape index: {}]   ;;  %s508_s4 = inlined_call_operand.vmem [shape: f32[8,1], index: 4, kind: output, shape index: {2}]   ;;  %s509_s3 = inlined_call_operand.vmem [shape: f32[8,1], index: 3, kind: output, shape index: {1}]   ;;  %s510_s2 = inlined_call_operand.vmem [shape: f32[8,1], index: 2, kind: output, shape index: {0}]  }
   0x1   :  { %v277_v0 = vld [vmem:[%s506_s0 + $0x2] sm:$0x1]  ;;  %v282_v1 = vld [vmem:[%s506_s0 + $0x6] sm:$0x1]  ;;  %v287_v2 = vld [vmem:[%s506_s0 + $0xa] sm:$0x1] }
   0x2   :  { %v292_v3 = vld [vmem:[%s506_s0 + $0xe] sm:$0x1]  ;;  %v297_v4 = vld [vmem:[%s506_s0 + $0x12] sm:$0x1]  ;;  %v302_v5 = vld [vmem:[%s506_s0 + $0x16] sm:$0x1]  ;;  %v111_v6 = vmul.f32 %v277_v0, %v277_v0  ;;  %v112_v7 = vmul.f32 %v282_v1, %v282_v1  ;;  %v113_v8 = vmul.f32 %v287_v2, %v287_v2 }
   0x3   :  { %v313_v9 = vld [vmem:[%s506_s0 + $0x1a] sm:$0x1]  ;;  %v318_v10 = vld [vmem:[%s506_s0 + $0x1e] sm:$0x1]  ;;  %vm67_vm4 = vcmask 1045509   ;;  %vm70_vm5 = vcmask 1046534   ;;  %v114_v11 = vmul.f32 %v292_v3, %v292_v3  ;;  %v115_v12 = vmul.f32 %v297_v4, %v297_v4 }
   0x4   :  { %vm73_vm6 = vcmask 1047559   ;;  %v116_v13 = vmul.f32 %v302_v5, %v302_v5  ;;  %v117_v14 = vmul.f32 %v313_v9, %v313_v9  ;;  %v118_v15 = vmul.f32 %v318_v10, %v318_v10  ;;  %v333_v16 = vld [vmem:[%s506_s0] sm:$0x1]  ;;  %v338_v17 = vld [vmem:[%s506_s0 + $0x4] sm:$0x1] }
   0x5   :  { %v127_v18 = vrot.slane %v112_v7, 7  ;;  %v129_v19 = vrot.slane %v113_v8, 6  ;;  %v131_v20 = vrot.slane %v114_v11, 5  ;;  %v133_v21 = vrot.slane %v115_v12, 4  ;;  %v343_v22 = vld [vmem:[%s506_s0 + $0x8] sm:$0x1] }
   0x6   :  { %v135_v23 = vrot.slane %v116_v13, 3  ;;  %v137_v24 = vrot.slane %v117_v14, 2  ;;  %v139_v25 = vrot.slane %v118_v15, 1  ;;  %v348_v26 = vld [vmem:[%s506_s0 + $0xc] sm:$0x1]  ;;  %v38_v27 = vmul.f32 %v333_v16, %v333_v16 }
   0x7   :  { %v128_v28 = vsel %vm55_vm0, %v127_v18, %v111_v6  ;;  %v356_v29 = vld [vmem:[%s506_s0 + $0x10] sm:$0x1]  ;;  %v361_v30 = vld [vmem:[%s506_s0 + $0x14] sm:$0x1]  ;;  %v366_v31 = vld [vmem:[%s506_s0 + $0x18] sm:$0x1]  ;;  %v39_v32 = vmul.f32 %v338_v17, %v338_v17  ;;  %v40_v33 = vmul.f32 %v343_v22, %v343_v22  ;;  %v41_v34 = vmul.f32 %v348_v26, %v348_v26 }
   0x8   :  { %v130_v35 = vsel %vm58_vm1, %v129_v19, %v128_v28  ;;  %v378_v36 = vld [vmem:[%s506_s0 + $0x1c] sm:$0x1]  ;;  %v42_v37 = vmul.f32 %v356_v29, %v356_v29  ;;  %v43_v38 = vmul.f32 %v361_v30, %v361_v30  ;;  %v44_v39 = vmul.f32 %v366_v31, %v366_v31  ;;  %v389_v40 = vld [vmem:[%s506_s0 + $0x1] sm:$0x1]  ;;  %v394_v41 = vld [vmem:[%s506_s0 + $0x5] sm:$0x1] }
   0x9   :  { %v132_v42 = vsel %vm61_vm2, %v131_v20, %v130_v35  ;;  %v45_v43 = vmul.f32 %v378_v36, %v378_v36  ;;  %v54_v44 = vrot.slane %v39_v32, 7  ;;  %v57_v45 = vrot.slane %v40_v33, 6  ;;  %v402_v46 = vld [vmem:[%s506_s0 + $0x9] sm:$0x1]  ;;  %v407_v47 = vld [vmem:[%s506_s0 + $0xd] sm:$0x1] }
   0xa   :  { %v134_v48 = vsel %vm64_vm3, %v133_v21, %v132_v42  ;;  %v60_v49 = vrot.slane %v41_v34, 5  ;;  %v63_v50 = vrot.slane %v42_v37, 4  ;;  %v66_v51 = vrot.slane %v43_v38, 3  ;;  %v413_v52 = vld [vmem:[%s506_s0 + $0x11] sm:$0x1] }
   0xb   :  { %v136_v53 = vsel %vm67_vm4, %v135_v23, %v134_v48  ;;  %v56_v54 = vsel %vm55_vm0, %v54_v44, %v38_v27  ;;  %v69_v55 = vrot.slane %v44_v39, 2  ;;  %v72_v56 = vrot.slane %v45_v43, 1  ;;  %v27_v57 = vld [vmem:[%s506_s0 + $0x15] sm:$0x1]  ;;  %v28_v58 = vld [vmem:[%s506_s0 + $0x19] sm:$0x1] }
   0xc   :  { %v138_v59 = vsel %vm70_vm5, %v137_v24, %v136_v53  ;;  %v59_v60 = vsel %vm58_vm1, %v57_v45, %v56_v54  ;;  %v29_v61 = vld [vmem:[%s506_s0 + $0x1d] sm:$0x1]  ;;  %v78_v62 = vmul.f32 %v389_v40, %v389_v40  ;;  %v79_v63 = vmul.f32 %v394_v41, %v394_v41 }
   0xd   :  { %v140_v6 = vsel %vm73_vm6, %v139_v25, %v138_v59  ;;  %v62_v7 = vsel %vm61_vm2, %v60_v49, %v59_v60  ;;  %v80_v8 = vmul.f32 %v402_v46, %v402_v46  ;;  %v81_v11 = vmul.f32 %v407_v47, %v407_v47 }
   0xe   :  { %142 = vadd.xlane.f32.xlu1 %v140_v6  ;;  %v65_v12 = vsel %vm64_vm3, %v63_v50, %v62_v7  ;;  %v82_v13 = vmul.f32 %v413_v52, %v413_v52  ;;  %v83_v14 = vmul.f32 %v27_v57, %v27_v57  ;;  %v84_v15 = vmul.f32 %v28_v58, %v28_v58 }
   0xf   :  { %v68_v18 = vsel %vm67_vm4, %v66_v51, %v65_v12  ;;  %v85_v19 = vmul.f32 %v29_v61, %v29_v61  ;;  %v94_v20 = vrot.slane %v79_v63, 7  ;;  %v96_v21 = vrot.slane %v80_v8, 6 }
  0x10   :  { %v71_v23 = vsel %vm70_vm5, %v69_v55, %v68_v18  ;;  %v98_v24 = vrot.slane %v81_v11, 5  ;;  %v100_v25 = vrot.slane %v82_v13, 4  ;;  %v102_v27 = vrot.slane %v83_v14, 3 }
  0x11   :  { %v74_v28 = vsel %vm73_vm6, %v72_v56, %v71_v23  ;;  %v95_v32 = vsel %vm55_vm0, %v94_v20, %v78_v62  ;;  %v104_v33 = vrot.slane %v84_v15, 2  ;;  %v106_v34 = vrot.slane %v85_v19, 1 }
  0x12   :  { %76 = vadd.xlane.f32.xlu0 %v74_v28  ;;  %v97_v35 = vsel %vm58_vm1, %v96_v21, %v95_v32  ;;  %v177_v37 = vmul.f32 %v277_v0, %v333_v16  ;;  %v178_v38 = vmul.f32 %v282_v1, %v338_v17  ;;  %v179_v39 = vmul.f32 %v287_v2, %v343_v22 }
  0x13   :  { %v99_v42 = vsel %vm61_vm2, %v98_v24, %v97_v35  ;;  %v180_v43 = vmul.f32 %v292_v3, %v348_v26  ;;  %v181_v44 = vmul.f32 %v297_v4, %v356_v29  ;;  %v182_v45 = vmul.f32 %v302_v5, %v361_v30 }
  0x14   :  { %v101_v48 = vsel %vm64_vm3, %v100_v25, %v99_v42  ;;  %v183_v0 = vmul.f32 %v313_v9, %v366_v31  ;;  %v184_v1 = vmul.f32 %v318_v10, %v378_v36  ;;  %v193_v2 = vrot.slane %v178_v38, 7  ;;  %v222_v38 = vld [vmem:[%s507_s1] sm:$0xff] }
  0x15   :  { %v103_v49 = vsel %vm67_vm4, %v102_v27, %v101_v48  ;;  %v195_v50 = vrot.slane %v179_v39, 6  ;;  %v197_v51 = vrot.slane %v180_v43, 5  ;;  %v199_v3 = vrot.slane %v181_v44, 4 }
  0x16   :  { %v105_v53 = vsel %vm70_vm5, %v104_v33, %v103_v49  ;;  %v194_v4 = vsel %vm55_vm0, %v193_v2, %v177_v37  ;;  %v201_v54 = vrot.slane %v182_v45, 3  ;;  %v203_v5 = vrot.slane %v183_v0, 2 }
  0x17   :  { %v107_v55 = vsel %vm73_vm6, %v106_v34, %v105_v53  ;;  %v196_v56 = vsel %vm58_vm1, %v195_v50, %v194_v4  ;;  %v205_v9 = vrot.slane %v184_v1, 1  ;;  %v144_v10 = vmul.f32 %v389_v40, %v333_v16 }
  0x18   :  { %109 = vadd.xlane.f32.xlu0 %v107_v55  ;;  %v198_v59 = vsel %vm61_vm2, %v197_v51, %v196_v56  ;;  %v145_v60 = vmul.f32 %v394_v41, %v338_v17  ;;  %v146_v62 = vmul.f32 %v402_v46, %v343_v22  ;;  %v147_v63 = vmul.f32 %v407_v47, %v348_v26 }
  0x19   :  { %v200_v6 = vsel %vm64_vm3, %v199_v3, %v198_v59  ;;  %v148_v7 = vmul.f32 %v413_v52, %v356_v29  ;;  %v149_v8 = vmul.f32 %v27_v57, %v361_v30  ;;  %v150_v16 = vmul.f32 %v28_v58, %v366_v31 }
  0x1a   :  { %v202_v40 = vsel %vm67_vm4, %v201_v54, %v200_v6  ;;  %v151_v11 = vmul.f32 %v29_v61, %v378_v36  ;;  %v160_v17 = vrot.slane %v145_v60, 7  ;;  %v162_v41 = vrot.slane %v146_v62, 6 }
  0x1b   :  { %v204_v22 = vsel %vm70_vm5, %v203_v5, %v202_v40  ;;  %v164_v46 = vrot.slane %v147_v63, 5  ;;  %v166_v12 = vrot.slane %v148_v7, 4  ;;  %v168_v13 = vrot.slane %v149_v8, 3 }
  0x1c   :  { %v206_v26 = vsel %vm73_vm6, %v205_v9, %v204_v22  ;;  %v161_v47 = vsel %vm55_vm0, %v160_v17, %v144_v10  ;;  %v170_v30 = vrot.slane %v150_v16, 2  ;;  %v172_v52 = vrot.slane %v151_v11, 1 }
  0x1d   :  { %208 = vadd.xlane.f32.xlu0 %v206_v26  ;;  %v163_v29 = vsel %vm58_vm1, %v162_v41, %v161_v47  ;;  %vm227_vm7 = vcmask 7168   ;;  %v223_v42 = vsub.f32 1.0, %v222_v38 }
  0x1e   :  { %v165_v31 = vsel %vm61_vm2, %v164_v46, %v163_v29 }
  0x1f   :  { %v167_v36 = vsel %vm64_vm3, %v166_v12, %v165_v31 }
  0x20   :  { %v169_v57 = vsel %vm67_vm4, %v168_v13, %v167_v36 }
  0x21   :  { %v171_v58 = vsel %vm70_vm5, %v170_v30, %v169_v57 }
  0x22   :  { %v173_v61 = vsel %vm73_vm6, %v172_v52, %v171_v58 }
  0x23   :  { %175 = vadd.xlane.f32.xlu1 %v173_v61 }
  0x9b   :  { %v143_v14 = vpop.xlane.xlu1 %142 }
  0x9f   :  { %v77_v15 = vpop.xlane.xlu0 %76 }
  0xa0   :  { %v214_v18 = vmul.f32 %v143_v14, %v77_v15 }
  0xa2   :  { %v215_v19 = vmax.f32 %v214_v18, 1e-12 }
  0xa4   :  { %245 = vrsqrt.f32 %v215_v19 }
  0xa5   :  { %v110_v20 = vpop.xlane.xlu0 %109 }
  0xa6   :  { %v210_v21 = vmul.f32 %v110_v20, %v77_v15 }
  0xa8   :  { %v211_v23 = vmax.f32 %v210_v21, 1e-12 }
  0xaa   :  { %247 = vrsqrt.f32 %v211_v23  ;;  %v209_v24 = vpop.xlane.xlu0 %208 }
  0xae   :  { %v246_v25 = vpop.eup %245 }
  0xaf   :  { %v217_v27 = vmul.f32 %v246_v25, %v209_v24 }
  0xb0   :  { %v176_v32 = vpop.xlane.xlu1 %175 }
  0xb1   :  { %v220_v28 = vsub.f32 1.0, %v217_v27 }
  0xb3   :  { %v221_v33 = vmul.f32 0.5, %v220_v28 }
  0xb4   :  { %v248_v34 = vpop.eup %247 }
  0xb5   :  { %v231_v35 = vsub.f32 1.0, %v221_v33  ;;  %v213_v37 = vmul.f32 %v248_v34, %v176_v32 }
  0xb7   :  { %232 = vst.msk [vmem:[%s508_s4] sm:$0xff] %vm227_vm7, %v231_v35  ;;  %v218_v39 = vsub.f32 1.0, %v213_v37 }
  0xb9   :  { %v219_v43 = vmul.f32 0.5, %v218_v39 }
  0xbb   :  { %v224_v44 = vsub.f32 %v219_v43, %v221_v33  ;;  %v229_v45 = vsub.f32 1.0, %v219_v43 }
  0xbd   :  { %v225_v48 = vadd.f32 %v224_v44, %v223_v42  ;;  %230 = vst.msk [vmem:[%s509_s3] sm:$0xff] %vm227_vm7, %v229_v45 }
  0xbf   :  { %v226_v0 = vmax.f32 %v225_v48, 0.0 }
  0xc1   :  { %228 = vst.msk [vmem:[%s510_s2] sm:$0xff] %vm227_vm7, %v226_v0 }

</bundles_post_ra>
